<compile_context>
chip_gen: v5e
topology: v5e:2x2
jax: 0.10.0
libtpu: 0.0.40
codegen_flags: <defaults>
</compile_context>

<pallas_src>
import functools

import numpy as np
import jax
import jax.numpy as jnp
from jax.experimental import pallas as pl
from jax.experimental.pallas import tpu as pltpu

_HALF_LOG_2PI = 0.5 * float(np.log(2.0 * np.pi))


def _svae_partials_kernel(x_ref, dmu_ref, dlv_ref, emu_ref, elv_ref,
                          recon_ref, kld_ref, *, batch, tile, need_mask):
    """Per-batch-tile partial sums (variable parts only; constants hoisted)."""
    i = pl.program_id(0)

    # ---- reconstruction NLL, variable part: diff^2*exp(-dlv) + dlv ----
    x = x_ref[...].astype(jnp.float32)
    dmu = dmu_ref[...].astype(jnp.float32)
    dlv = dlv_ref[...].astype(jnp.float32)
    diff = x - dmu
    nll_rows = jnp.sum(diff * diff * jnp.exp(-dlv) + dlv,
                       axis=1, keepdims=True)                  # (TB, 1)

    # ---- KLD, variable part: elv - emu^2 - exp(elv) ----
    emu = emu_ref[...].astype(jnp.float32)
    elv = elv_ref[...].astype(jnp.float32)
    kld_rows = jnp.sum(elv - emu * emu - jnp.exp(elv),
                       axis=1, keepdims=True)                  # (TB, 1)

    if need_mask:
        # Boundary-clamped tail block: rows >= batch hold unspecified data.
        # Mask only the tiny per-row column (select -> no NaN propagation).
        row = jax.lax.broadcasted_iota(jnp.int32, (tile, 1), 0) + i * tile
        valid = row < batch
        nll_rows = jnp.where(valid, nll_rows, 0.0)
        kld_rows = jnp.where(valid, kld_rows, 0.0)

    # Lane-dense full-block stores of the per-tile partial sums.
    recon_ref[...] = jnp.broadcast_to(jnp.sum(nll_rows), (1, 8, 128))
    kld_ref[...] = jnp.broadcast_to(jnp.sum(kld_rows), (1, 8, 128))


def _vmem_capacity_bytes():
    try:
        info = pltpu.get_tpu_info()
        cap = getattr(info, "vmem_capacity_bytes", None)
        if cap:
            return int(cap)
    except Exception:
        pass
    return 64 * 1024 * 1024  # conservative default (v7x per-TC VMEM)


def _choose_batch_tile(b, d, z, itemsize):
    """Pick the batch-tile size and vmem limit from the chip's VMEM capacity."""
    vmem = _vmem_capacity_bytes()
    if vmem >= 100 * 1024 * 1024:          # v5e / v6e: 128 MiB physical VMEM
        budget = 48 * 1024 * 1024
        vmem_limit = 96 * 1024 * 1024
    else:                                   # v7x: 64 MiB per TensorCore
        budget = 24 * 1024 * 1024
        vmem_limit = 48 * 1024 * 1024
    # Double-buffered input tiles: 3 dec-side (TB, D) + 2 enc-side (TB, Z).
    per_row = 2 * (3 * d + 2 * z) * itemsize
    tb = budget // max(per_row, 1)
    tb = max(8, (int(tb) // 8) * 8)         # sublane-aligned
    b8 = ((b + 7) // 8) * 8                 # never wider than the 8-aligned batch
    return min(tb, b8), vmem_limit


def svae_loss(x, enc_mu, enc_logvar, dec_mu, dec_logvar, beta=1.0,
              tile_rows=None):
    """Pallas TPU implementation of SVAELoss.forward (returns scalar f32)."""
    b, d = x.shape
    z = enc_mu.shape[1]
    itemsize = max(jnp.dtype(a.dtype).itemsize
                   for a in (x, dec_mu, dec_logvar, enc_mu, enc_logvar))
    tb, vmem_limit = _choose_batch_tile(b, d, z, itemsize)
    if tile_rows is not None:               # test hook: force a small tile
        tb = max(8, (int(tile_rows) // 8) * 8)
    num_tiles = int(pl.cdiv(b, tb))
    need_mask = (b % tb != 0)

    kernel = functools.partial(_svae_partials_kernel,
                               batch=b, tile=tb, need_mask=need_mask)

    recon_out, kld_out = pl.pallas_call(
        kernel,
        out_shape=(jax.ShapeDtypeStruct((num_tiles, 8, 128), jnp.float32),
                   jax.ShapeDtypeStruct((num_tiles, 8, 128), jnp.float32)),
        grid=(num_tiles,),
        in_specs=[
            pl.BlockSpec((tb, d), lambda i: (i, 0)),   # x
            pl.BlockSpec((tb, d), lambda i: (i, 0)),   # dec_mu
            pl.BlockSpec((tb, d), lambda i: (i, 0)),   # dec_logvar
            pl.BlockSpec((tb, z), lambda i: (i, 0)),   # enc_mu
            pl.BlockSpec((tb, z), lambda i: (i, 0)),   # enc_logvar
        ],
        out_specs=(pl.BlockSpec((1, 8, 128), lambda i: (i, 0, 0)),
                   pl.BlockSpec((1, 8, 128), lambda i: (i, 0, 0))),
        compiler_params=pltpu.CompilerParams(
            dimension_semantics=("parallel",),
            vmem_limit_bytes=vmem_limit),
    )(x, dec_mu, dec_logvar, enc_mu, enc_logvar)

    # Tiny cross-tile reduction + all hoisted constants on the scalar path.
    recon_sum = jnp.sum(recon_out[:, 0, 0])
    kld_sum = jnp.sum(kld_out[:, 0, 0])
    inv_b = 1.0 / b
    recon_mean = 0.5 * recon_sum * inv_b + d * _HALF_LOG_2PI
    kld_mean = (-0.5 * float(beta)) * (kld_sum * inv_b + float(z))
    return recon_mean + kld_mean


def _reference(x, enc_mu, enc_logvar, dec_mu, dec_logvar, beta=1.0):
    recon = jnp.sum(
        0.5 * (x - dec_mu) ** 2 * jnp.exp(-dec_logvar)
        + 0.5 * dec_logvar + _HALF_LOG_2PI, axis=1)
    kld = -beta * 0.5 * jnp.sum(
        1.0 + enc_logvar - enc_mu ** 2 - jnp.exp(enc_logvar), axis=1)
    return jnp.mean(recon + kld)


if __name__ == "__main__":
    key = jax.random.PRNGKey(0)

    def make_inputs(b, d, z, k):
        ks = jax.random.split(k, 5)
        x = jax.random.normal(ks[0], (b, d), dtype=jnp.float32)
        dec_mu = jax.random.normal(ks[1], (b, d), dtype=jnp.float32)
        dec_logvar = 0.1 * jax.random.normal(ks[2], (b, d), dtype=jnp.float32)
        enc_mu = jax.random.normal(ks[3], (b, z), dtype=jnp.float32)
        enc_logvar = 0.1 * jax.random.normal(ks[4], (b, z), dtype=jnp.float32)
        return x, enc_mu, enc_logvar, dec_mu, dec_logvar

    k1, k2, k3 = jax.random.split(key, 3)

    # Case 1: tile-aligned batch (B=8, D=128, Z=32), single tile, no mask.
    args1 = make_inputs(8, 128, 32, k1)
    loss1 = jax.block_until_ready(svae_loss(*args1, beta=1.0))
    ref1 = _reference(*args1, beta=1.0)
    assert jnp.allclose(loss1, ref1, rtol=1e-5, atol=1e-5), (loss1, ref1)

    # Case 2: ragged batch (B=13) -> boundary-clamped tail block + row mask.
    args2 = make_inputs(13, 256, 32, k2)
    loss2 = jax.block_until_ready(svae_loss(*args2, beta=0.7))
    ref2 = _reference(*args2, beta=0.7)
    assert jnp.allclose(loss2, ref2, rtol=1e-5, atol=1e-5), (loss2, ref2)

    # Case 3: multiple tiles + ragged tail (forced 16-row tiles, B=50).
    args3 = make_inputs(50, 128, 16, k3)
    loss3 = jax.block_until_ready(svae_loss(*args3, beta=1.3, tile_rows=16))
    ref3 = _reference(*args3, beta=1.3)
    assert jnp.allclose(loss3, ref3, rtol=1e-5, atol=1e-5), (loss3, ref3)

    print("KERNEL_OK")
</pallas_src>

<mosaic_0001>
module attributes {stable_mosaic.version = 11 : i64} {
  func.func @_svae_partials_kernel(%arg0: i32, %arg1: memref<8x128xf32, #tpu.memory_space<vmem>>, %arg2: memref<8x128xf32, #tpu.memory_space<vmem>>, %arg3: memref<8x128xf32, #tpu.memory_space<vmem>>, %arg4: memref<8x32xf32, #tpu.memory_space<vmem>>, %arg5: memref<8x32xf32, #tpu.memory_space<vmem>>, %arg6: memref<1x8x128xf32, #tpu.memory_space<vmem>>, %arg7: memref<1x8x128xf32, #tpu.memory_space<vmem>>) attributes {dimension_semantics = [#tpu.dimension_semantics<parallel>], iteration_bounds = array<i64: 1>, scalar_prefetch = 0 : i64, scratch_operands = 0 : i64, tpu.core_type = #tpu.core_type<tc>, window_params = [{transform_indices = @transform_0, window_bounds = array<i64: 8, 128>}, {transform_indices = @transform_1, window_bounds = array<i64: 8, 128>}, {transform_indices = @transform_2, window_bounds = array<i64: 8, 128>}, {transform_indices = @transform_3, window_bounds = array<i64: 8, 32>}, {transform_indices = @transform_4, window_bounds = array<i64: 8, 32>}, {transform_indices = @transform_5, window_bounds = array<i64: 1, 8, 128>}, {transform_indices = @transform_6, window_bounds = array<i64: 1, 8, 128>}]} {
    %c0 = arith.constant 0 : index
    %c0_0 = arith.constant 0 : index
    %0 = vector.load %arg1[%c0, %c0_0] : memref<8x128xf32, #tpu.memory_space<vmem>>, vector<8x128xf32>
    %c0_1 = arith.constant 0 : index
    %c0_2 = arith.constant 0 : index
    %1 = vector.load %arg2[%c0_1, %c0_2] : memref<8x128xf32, #tpu.memory_space<vmem>>, vector<8x128xf32>
    %c0_3 = arith.constant 0 : index
    %c0_4 = arith.constant 0 : index
    %2 = vector.load %arg3[%c0_3, %c0_4] : memref<8x128xf32, #tpu.memory_space<vmem>>, vector<8x128xf32>
    %3 = arith.subf %0, %1 : vector<8x128xf32>
    %4 = arith.mulf %3, %3 : vector<8x128xf32>
    %cst = arith.constant 0.000000e+00 : f32
    %5 = vector.broadcast %cst : f32 to vector<8x128xf32>
    %6 = arith.subf %5, %2 : vector<8x128xf32>
    %7 = math.exp %6 : vector<8x128xf32>
    %8 = arith.mulf %4, %7 : vector<8x128xf32>
    %9 = arith.addf %8, %2 : vector<8x128xf32>
    %cst_5 = arith.constant dense<0.000000e+00> : vector<8xf32>
    %10 = vector.multi_reduction <add>, %9, %cst_5 [1] : vector<8x128xf32> to vector<8xf32>
    %11 = vector.shape_cast %10 : vector<8xf32> to vector<8x1xf32>
    %c0_6 = arith.constant 0 : index
    %c0_7 = arith.constant 0 : index
    %12 = vector.load %arg4[%c0_6, %c0_7] : memref<8x32xf32, #tpu.memory_space<vmem>>, vector<8x32xf32>
    %c0_8 = arith.constant 0 : index
    %c0_9 = arith.constant 0 : index
    %13 = vector.load %arg5[%c0_8, %c0_9] : memref<8x32xf32, #tpu.memory_space<vmem>>, vector<8x32xf32>
    %14 = arith.mulf %12, %12 : vector<8x32xf32>
    %15 = arith.subf %13, %14 : vector<8x32xf32>
    %16 = math.exp %13 : vector<8x32xf32>
    %17 = arith.subf %15, %16 : vector<8x32xf32>
    %cst_10 = arith.constant dense<0.000000e+00> : vector<8xf32>
    %18 = vector.multi_reduction <add>, %17, %cst_10 [1] : vector<8x32xf32> to vector<8xf32>
    %19 = vector.shape_cast %18 : vector<8xf32> to vector<8x1xf32>
    %20 = vector.shape_cast %11 : vector<8x1xf32> to vector<1x8x1xf32>
    %cst_11 = arith.constant dense<0.000000e+00> : vector<1xf32>
    %21 = vector.multi_reduction <add>, %20, %cst_11 [1, 2] : vector<1x8x1xf32> to vector<1xf32>
    %22 = vector.shape_cast %21 : vector<1xf32> to vector<1x1x1xf32>
    %23 = vector.extract %22[0, 0, 0] : f32 from vector<1x1x1xf32>
    %24 = vector.broadcast %23 : f32 to vector<1x8x128xf32>
    %c0_12 = arith.constant 0 : index
    %c0_13 = arith.constant 0 : index
    %c0_14 = arith.constant 0 : index
    %25 = vector.load %arg6[%c0_12, %c0_13, %c0_14] : memref<1x8x128xf32, #tpu.memory_space<vmem>>, vector<1x8x128xf32>
    tpu.vector_store %arg6[%c0_12, %c0_13, %c0_14], %24 {strides = array<i32>} : memref<1x8x128xf32, #tpu.memory_space<vmem>>, vector<1x8x128xf32>,
    %26 = vector.shape_cast %19 : vector<8x1xf32> to vector<1x8x1xf32>
    %cst_15 = arith.constant dense<0.000000e+00> : vector<1xf32>
    %27 = vector.multi_reduction <add>, %26, %cst_15 [1, 2] : vector<1x8x1xf32> to vector<1xf32>
    %28 = vector.shape_cast %27 : vector<1xf32> to vector<1x1x1xf32>
    %29 = vector.extract %28[0, 0, 0] : f32 from vector<1x1x1xf32>
    %30 = vector.broadcast %29 : f32 to vector<1x8x128xf32>
    %c0_16 = arith.constant 0 : index
    %c0_17 = arith.constant 0 : index
    %c0_18 = arith.constant 0 : index
    %31 = vector.load %arg7[%c0_16, %c0_17, %c0_18] : memref<1x8x128xf32, #tpu.memory_space<vmem>>, vector<1x8x128xf32>
    tpu.vector_store %arg7[%c0_16, %c0_17, %c0_18], %30 {strides = array<i32>} : memref<1x8x128xf32, #tpu.memory_space<vmem>>, vector<1x8x128xf32>,
    return
  }
  func.func @transform_0(%arg0: i32) -> (i32, i32) {
    %c0_i32 = arith.constant 0 : i32
    %c0_i32_0 = arith.constant 0 : i32
    return %arg0, %c0_i32 : i32, i32
  }
  func.func @transform_1(%arg0: i32) -> (i32, i32) {
    %c0_i32 = arith.constant 0 : i32
    %c0_i32_0 = arith.constant 0 : i32
    return %arg0, %c0_i32 : i32, i32
  }
  func.func @transform_2(%arg0: i32) -> (i32, i32) {
    %c0_i32 = arith.constant 0 : i32
    %c0_i32_0 = arith.constant 0 : i32
    return %arg0, %c0_i32 : i32, i32
  }
  func.func @transform_3(%arg0: i32) -> (i32, i32) {
    %c0_i32 = arith.constant 0 : i32
    %c0_i32_0 = arith.constant 0 : i32
    return %arg0, %c0_i32 : i32, i32
  }
  func.func @transform_4(%arg0: i32) -> (i32, i32) {
    %c0_i32 = arith.constant 0 : i32
    %c0_i32_0 = arith.constant 0 : i32
    return %arg0, %c0_i32 : i32, i32
  }
  func.func @transform_5(%arg0: i32) -> (i32, i32, i32) {
    %c0_i32 = arith.constant 0 : i32
    %c0_i32_0 = arith.constant 0 : i32
    %c0_i32_1 = arith.constant 0 : i32
    return %arg0, %c0_i32, %c0_i32_0 : i32, i32, i32
  }
  func.func @transform_6(%arg0: i32) -> (i32, i32, i32) {
    %c0_i32 = arith.constant 0 : i32
    %c0_i32_0 = arith.constant 0 : i32
    %c0_i32_1 = arith.constant 0 : i32
    return %arg0, %c0_i32, %c0_i32_0 : i32, i32, i32
  }
}

</mosaic_0001>

<bundles_post_ra>
// kernel: tpu_custom_call.1
= control target key start
LH: loop header
LB: loop body
LE: loop exit
PB: predicated region body
PF: predicated region fallthrough
CT: control target
= control target key end

     0   :  { %12 = vsyncpa [#allocation3], 0  ;;  %s431_s0 = inlined_call_operand.hbm [shape: f32[8,128], index: 0, kind: input, shape index: {}]   ;;  %s432_s1 = inlined_call_operand.hbm [shape: f32[8,128], index: 1, kind: input, shape index: {}]   ;;  %s433_s2 = inlined_call_operand.hbm [shape: f32[8,128], index: 2, kind: input, shape index: {}]   ;;  %s434_s3 = inlined_call_operand.hbm [shape: f32[8,32], index: 3, kind: input, shape index: {}]   ;;  %s435_s4 = inlined_call_operand.hbm [shape: f32[8,32], index: 4, kind: input, shape index: {}]   ;;  %s436_s5 = inlined_call_operand.hbm [shape: f32[1,8,128], index: 5, kind: output, shape index: {0}]   ;;  %s437_s6 = inlined_call_operand.hbm [shape: f32[1,8,128], index: 6, kind: output, shape index: {1}]  }
   0x1   :  { %13 = vsyncpa [#allocation6], 0 }
   0x2   :  { %14 = vsyncpa [#allocation9], 0 }
   0x3   :  { %15 = vsyncpa [#allocation4], 0  ;;  %s33_s23 = sshll.u32 %s432_s1, 4  ;;  %s34_s23 = int_to_ptr.hbm [resolvable:$true] %s33_s23 }
   0x4   :  { %16 = vsyncpa [#allocation13], 0  ;;  %s368_s24 = smov [#allocation5]   ;;  %s55_s28 = sshll.u32 %s434_s3, 4  ;;  %s56_s28 = int_to_ptr.hbm [resolvable:$true] %s55_s28 }
   0x5   :  { %s35_s25 = sshll.u32 %s368_s24, 4  ;;  %s369_s29 = smov [#allocation8]   ;;  %s36_s25 = int_to_ptr.vmem [resolvable:$true] %s35_s25 }
   0x6   :  { %38 = dma.hbm_to_vmem [thread:$0]  %s34_s23, 128, %s36_s25, [#allocation6]  }
   0x7   :  { %s57_s30 = sshll.u32 %s369_s29, 4  ;;  %s22_s9 = sshll.u32 %s431_s0, 4  ;;  %s58_s30 = int_to_ptr.vmem [resolvable:$true] %s57_s30  ;;  %s23_s9 = int_to_ptr.hbm [resolvable:$true] %s22_s9 }
   0x8   :  { %60 = dma.hbm_to_vmem [thread:$0]  %s56_s28, 128, %s58_s30, [#allocation9]  }
   0x9   :  { %s44_s11 = sshll.u32 %s433_s2, 4  ;;  %s370_s12 = smov [#allocation2]   ;;  %s45_s11 = int_to_ptr.hbm [resolvable:$true] %s44_s11 }
   0xa   :  { %s24_s13 = sshll.u32 %s370_s12, 4  ;;  %s371_s3 = smov [#allocation7]   ;;  %s25_s13 = int_to_ptr.vmem [resolvable:$true] %s24_s13 }
   0xb   :  { %27 = dma.hbm_to_vmem [thread:$0]  %s23_s9, 128, %s25_s13, [#allocation3]  }
   0xc   :  { %s46_s14 = sshll.u32 %s371_s3, 4  ;;  %s66_s17 = sshll.u32 %s435_s4, 4  ;;  %s47_s14 = int_to_ptr.vmem [resolvable:$true] %s46_s14  ;;  %s67_s17 = int_to_ptr.hbm [resolvable:$true] %s66_s17 }
   0xd   :  { %49 = dma.hbm_to_vmem [thread:$0]  %s45_s11, 128, %s47_s14, [#allocation6]  }
   0xe   :  { %s372_s0 = smov [#allocation10]  }
   0xf   :  { %s68_s18 = sshll.u32 %s372_s0, 4  ;;  %s69_s18 = int_to_ptr.vmem [resolvable:$true] %s68_s18 }
  0x10   :  { %71 = dma.hbm_to_vmem [thread:$0]  %s67_s17, 128, %s69_s18, [#allocation9]  }
  0x11   :  { %358 = dma.done.wait [#allocation3], 128  }
  0x12   :  { %359 = vsyncadd [#allocation3], 4294967168 }
  0x13   :  { %360 = dma.done.wait [#allocation6], 256  }
  0x14   :  { %361 = vsyncadd [#allocation6], 4294967040 }
  0x15   :  { %362 = dma.done.wait [#allocation9], 256  }
  0x16   :  { %363 = vsyncadd [#allocation9], 4294967040  ;;  %v94_v0 = vld [vmem:[#allocation7] sm:$0xff]  ;;  %v92_v1 = vld [vmem:[#allocation2] sm:$0xff]  ;;  %vm111_vm0 = vcmask 261120   ;;  %vm115_vm1 = vcmask 7168  }
  0x17   :  { %v93_v2 = vld [vmem:[#allocation5] sm:$0xff]  ;;  %v97_v3 = vsub.f32 0.0, %v94_v0  ;;  %v105_v4 = vld [vmem:[#allocation10] sm:$0xff]  ;;  %v104_v8 = vld [vmem:[#allocation8] sm:$0xff]  ;;  %s373_s2 = smov [#allocation11]   ;;  %s147_s21 = sshll.u32 %s436_s5, 4  ;;  %s148_s21 = int_to_ptr.hbm [resolvable:$true] %s147_s21 }
  0x18   :  { %v95_v6 = vsub.f32 %v92_v1, %v93_v2  ;;  %v108_v7 = vmul.f32 1.442695, %v105_v4  ;;  %v106_v10 = vmul.f32 %v104_v8, %v104_v8  ;;  %s145_s4 = sshll.u32 %s373_s2, 4  ;;  %s374_s23 = smov [#allocation12]   ;;  %s146_s4 = int_to_ptr.vmem [resolvable:$true] %s145_s4 }
  0x19   :  { %v98_v5 = vmul.f32 1.442695, %v97_v3  ;;  %s156_s24 = sshll.u32 %s374_s23, 4  ;;  %s158_s27 = sshll.u32 %s437_s6, 4  ;;  %s157_s24 = int_to_ptr.vmem [resolvable:$true] %s156_s24  ;;  %s159_s27 = int_to_ptr.hbm [resolvable:$true] %s158_s27 }
  0x1a   :  { %v96_v9 = vmul.f32 %v95_v6, %v95_v6  ;;  %v107_v13 = vsub.f32 %v105_v4, %v106_v10 }
  0x1b   :  { %186 = vpow2.f32 %v98_v5 }
  0x1c   :  { %188 = vpow2.f32 %v108_v7 }
  0x21   :  { %v187_v11 = vpop.eup %186 }
  0x22   :  { %v100_v12 = vmul.f32 %v187_v11, %v96_v9  ;;  %v189_v14 = vpop.eup %188 }
  0x23   :  { %v110_v16 = vsub.f32 %v107_v13, %v189_v14 }
  0x24   :  { %v101_v15 = vadd.f32 %v100_v12, %v94_v0 }
  0x25   :  { %v112_v17 = vsel %vm111_vm0, %v110_v16, 0.0 }
  0x26   :  { %102 = vadd.xlane.f32.xlu0 %v101_v15 }
  0x2e   :  { %113 = vadd.xlane.f32.xlu0 %v112_v17 }
  0x99   :  { %v103_v18 = vpop.xlane.xlu0 %102 }
  0x9a   :  { %v116_v19 = vsel %vm115_vm1, %v103_v18, 0.0 }
  0x9b   :  { %117 = vadd.xlane.f32.xlu1 %v116_v19 }
  0xa1   :  { %v114_v20 = vpop.xlane.xlu0 %113 }
  0xa2   :  { %v128_v21 = vsel %vm115_vm1, %v114_v20, 0.0 }
  0xa3   :  { %129 = vadd.xlane.f32.xlu1 %v128_v21 }
 0x10e   :  { %v118_v22 = vpop.xlane.xlu1 %117 }
 0x10f   :  { %v119_v23 = vrot.slane %v118_v22, 4 }
 0x111   :  { %v120_v24 = vadd.f32 %v119_v23, %v118_v22 }
 0x113   :  { %v121_v25 = vrot.slane %v120_v24, 2 }
 0x115   :  { %v122_v26 = vadd.f32 %v121_v25, %v120_v24 }
 0x116   :  { %v130_v27 = vpop.xlane.xlu1 %129 }
 0x117   :  { %v131_v28 = vrot.slane %v130_v27, 4  ;;  %v123_v29 = vrot.slane %v122_v26, 1 }
 0x119   :  { %v132_v30 = vadd.f32 %v131_v28, %v130_v27  ;;  %v124_v31 = vadd.f32 %v123_v29, %v122_v26 }
 0x11b   :  { %v133_v32 = vrot.slane %v132_v30, 2  ;;  %175 = vpush %v124_v31 }
 0x11d   :  { %v134_v33 = vadd.f32 %v133_v32, %v132_v30 }
 0x11f   :  { %v135_v34 = vrot.slane %v134_v33, 1 }
 0x121   :  { %v136_v35 = vadd.f32 %v135_v34, %v134_v33 }
 0x123   :  { %177 = vpush %v136_v35 }
 0x14c   :  { %s176_s22 = spop %175 }
 0x14d   :  { %v126_v36 = vstv %s176_s22 }
 0x14e   :  { %127 = vst [vmem:[#allocation11] sm:$0xff] %v126_v36 }
 0x14f   :  { %150 = dma.vmem_to_hbm [thread:$0]  %s146_s4, 128, %s148_s21, [#allocation4]  }
 0x154   :  { %s178_s28 = spop %177 }
 0x155   :  { %v138_v37 = vstv %s178_s28 }
 0x156   :  { %139 = vst [vmem:[#allocation12] sm:$0xff] %v138_v37 }
 0x157   :  { %161 = dma.vmem_to_hbm [thread:$0]  %s157_s24, 128, %s159_s27, [#allocation13]  }
 0x158   :  { %364 = dma.done.wait [#allocation4], 128  }
 0x159   :  { %365 = vsyncadd [#allocation4], 4294967168 }
 0x15a   :  { %366 = dma.done.wait [#allocation13], 128  }
 0x15b   :  { %367 = vsyncadd [#allocation13], 4294967168 }
 0x15c   :  { %170 = vsyncpa [#allocation3], 1 }
 0x15d   :  { %171 = vsyncpa [#allocation6], 1 }
 0x15e   :  { %172 = vsyncpa [#allocation9], 1 }
 0x15f   :  { %173 = vsyncpa [#allocation4], 1 }
 0x160   :  { %174 = vsyncpa [#allocation13], 1 }

</bundles_post_ra>
